<compile_context>
chip_gen: v7x
topology: tpu7x:2x2x1
jax: 0.10.0
libtpu: 0.0.40
codegen_flags: <defaults>
</compile_context>

<pallas_src>
import functools

import jax
import jax.numpy as jnp
from jax.experimental import pallas as pl
from jax.experimental.pallas import tpu as pltpu

# Fixed (non-trainable) weights, exactly as in __init__ (kernel_y == kernel_x).
_KERNEL_X = ((-1.0, 0.0, 1.0),
             (-2.0, 0.0, 2.0),
             (-1.0, 0.0, 1.0))
_KERNEL_Y = _KERNEL_X


def _round_up(x, m):
    return (x + m - 1) // m * m


def _pick_tile_h(h_out, wp, wp_out, max_tile_h, vmem_budget_bytes):
    """Pick a multiple-of-8 strip height that fits the VMEM budget.

    Prefers a tile height that divides h_out exactly (no H padding and no
    masked output rows) unless the best such divisor is much smaller than the
    budget-capped height (tiny strips -> per-step overhead dominates).
    """
    def vmem_need(th):
        # input double buffer + Pallas output double buffer + ~3 strip temps
        return 4 * (2 * (th + 2) * wp + 2 * th * wp_out + 3 * th * wp)

    cap = max(8, (max_tile_h // 8) * 8)
    while cap > 8 and vmem_need(cap) > vmem_budget_bytes:
        cap -= 8
    cap = min(cap, _round_up(h_out, 8))
    cap = max(cap, 8)

    best_div = 0
    if h_out % 8 == 0:
        for th in range(8, min(cap, h_out) + 1, 8):
            if h_out % th == 0:
                best_div = th
    if best_div and best_div * 4 >= min(cap, h_out):
        return best_div
    return cap


def _make_kernel(tile_h, num_strips, wp, wp_out):
    """Build the strip kernel with static tiling constants closed over."""
    th2 = tile_h + 2  # haloed strip height

    def kernel(x_hbm, o_ref, xbuf, sem):
        # grid = (N, num_strips); x_hbm is the whole input in HBM.
        b = pl.program_id(0)
        j = pl.program_id(1)
        slot = j % 2

        def copy_desc(strip, slot_):
            row0 = pl.multiple_of(strip * tile_h, 8)
            return pltpu.make_async_copy(
                x_hbm.at[b, 0, pl.ds(row0, th2), :],
                xbuf.at[slot_],
                sem.at[slot_],
            )

        # Prime the pipeline on the first strip of every image (megacore-safe).
        @pl.when(j == 0)
        def _():
            copy_desc(0, slot).start()

        # Prefetch the next strip (within this image) into the other buffer.
        @pl.when(j + 1 < num_strips)
        def _():
            copy_desc(j + 1, 1 - slot).start()

        # Wait for the current strip.
        copy_desc(j, slot).wait()

        # Ref-indexed row windows (avoid loading the whole haloed strip and
        # slicing the value -> fewer full-strip VMEM temporaries).
        top = xbuf[slot, 0:tile_h, :]
        mid = xbuf[slot, 1:tile_h + 1, :]
        bot = xbuf[slot, 2:tile_h + 2, :]
        # Separable vertical pass (adds only; mid+mid instead of 2*mid).
        t = top + (mid + mid) + bot            # (tile_h, wp)
        # Horizontal difference kept lane-dense via a cyclic lane shift; the
        # two wrapped columns land at lanes >= W-2 which the masked edge
        # writeback (output width is exactly W-2) discards.
        t_shift = jnp.concatenate([t[:, 2:], t[:, :2]], axis=1)
        a = jnp.abs(t_shift - t)               # |grad_x|
        g = a + a                              # |grad_x| + |grad_y| (ky == kx)
        o_ref[0, 0, :, :] = g[:, :wp_out].astype(o_ref.dtype)

    return kernel


@functools.partial(jax.jit, static_argnames=("max_tile_h",))
def gradient_net(x, *, max_tile_h=512):
    """x: (N, 1, H, W) float32 (NCHW). Returns (N, 1, H-2, W-2)."""
    n, c, h, w = x.shape
    assert c == 1, "Gradient_Net uses single-channel 3x3 kernels (C must be 1)."
    h_out, w_out = h - 2, w - 2
    assert h_out >= 1 and w_out >= 1, "input spatial dims must be >= 3"

    wp = _round_up(w, 128)          # lane-dense compute width
    wp_out = _round_up(w_out, 128)  # lane-dense output block width (>= w_out)

    # Budget sized for v7x's 64 MiB/TC VMEM (with headroom); also fine on
    # v5e/v6e where physical VMEM is 128 MiB.
    vmem_budget = 36 * 1024 * 1024
    tile_h = _pick_tile_h(h_out, wp, wp_out, max_tile_h, vmem_budget)
    num_strips = pl.cdiv(h_out, tile_h)

    # Pad only when required: W to a lane multiple, H so every haloed strip
    # DMA stays in bounds.  For aligned inputs this is skipped entirely.
    h_needed = num_strips * tile_h + 2
    need_w_pad = (wp != w)
    need_h_pad = (h_needed != h)
    if need_w_pad or need_h_pad:
        x = jnp.pad(x, ((0, 0), (0, 0), (0, h_needed - h), (0, wp - w)))

    kernel = _make_kernel(tile_h, num_strips, wp, wp_out)

    vmem_need = 4 * (2 * (tile_h + 2) * wp + 2 * tile_h * wp_out
                     + 3 * tile_h * wp)
    vmem_limit = int(min(60 * 1024 * 1024,
                         max(32 * 1024 * 1024, vmem_need + 16 * 1024 * 1024)))

    cost = pl.CostEstimate(
        flops=6 * n * h_out * w_out,
        transcendentals=0,
        bytes_accessed=4 * n * (num_strips * (tile_h + 2) * wp
                                + h_out * w_out),
    )

    return pl.pallas_call(
        kernel,
        out_shape=jax.ShapeDtypeStruct((n, 1, h_out, w_out), x.dtype),
        grid_spec=pltpu.PrefetchScalarGridSpec(
            num_scalar_prefetch=0,
            grid=(n, num_strips),
            in_specs=[pl.BlockSpec(memory_space=pl.ANY)],   # raw HBM, manual DMA
            out_specs=pl.BlockSpec((1, 1, tile_h, wp_out),
                                   lambda b, j: (b, 0, j, 0)),
            scratch_shapes=[
                pltpu.VMEM((2, tile_h + 2, wp), x.dtype),   # double-buffered strip
                pltpu.SemaphoreType.DMA((2,)),
            ],
        ),
        compiler_params=pltpu.CompilerParams(
            dimension_semantics=("parallel", "arbitrary"),
            vmem_limit_bytes=vmem_limit,
        ),
        cost_estimate=cost,
    )(x)


def _reference(x):
    """Pure-JAX reference (two lax convs, as in the PyTorch module)."""
    kx = jnp.asarray(_KERNEL_X, jnp.float32)[None, None]   # (1,1,3,3) OIHW
    ky = jnp.asarray(_KERNEL_Y, jnp.float32)[None, None]
    dn = jax.lax.conv_dimension_numbers(x.shape, kx.shape, ("NCHW", "OIHW", "NCHW"))
    gx = jax.lax.conv_general_dilated(x, kx, (1, 1), "VALID", dimension_numbers=dn)
    gy = jax.lax.conv_general_dilated(x, ky, (1, 1), "VALID", dimension_numbers=dn)
    return jnp.abs(gx) + jnp.abs(gy)


if __name__ == "__main__":
    key = jax.random.PRNGKey(0)
    # Small NCHW input consistent with the module: single-channel images.
    x = jax.random.normal(key, (2, 1, 16, 16), dtype=jnp.float32)

    out = jax.block_until_ready(gradient_net(x))
    ref = _reference(x)

    assert out.shape == (2, 1, 14, 14), out.shape
    assert jnp.allclose(out, ref, atol=1e-5, rtol=1e-5), "mismatch vs reference"

    print("KERNEL_OK")
</pallas_src>

<mosaic_0001>
module attributes {stable_mosaic.version = 11 : i64} {
  func.func @kernel(%arg0: i32, %arg1: i32, %arg2: memref<2x1x18x128xf32, #tpu.memory_space<any>>, %arg3: memref<1x1x16x128xf32, #tpu.memory_space<vmem>>, %arg4: memref<2x18x128xf32, #tpu.memory_space<vmem>>, %arg5: memref<2x!tpu.dma_semaphore, #tpu.memory_space<semaphore_mem>>) attributes {dimension_semantics = [#tpu.dimension_semantics<parallel>, #tpu.dimension_semantics<arbitrary>], iteration_bounds = array<i64: 2, 1>, scalar_prefetch = 0 : i64, scratch_operands = 2 : i64, tpu.core_type = #tpu.core_type<tc>, window_params = [{}, {transform_indices = @transform_1, window_bounds = array<i64: 1, 1, 16, 128>}]} {
    %c2_i32 = arith.constant 2 : i32
    %c0_i32 = arith.constant 0 : i32
    %0 = arith.cmpi eq, %c2_i32, %c0_i32 : i32
    %c1_i32 = arith.constant 1 : i32
    %1 = arith.select %0, %c1_i32, %c2_i32 : i32
    %2 = arith.remsi %arg1, %1 : i32
    %c0_i32_0 = arith.constant 0 : i32
    %3 = arith.cmpi ne, %2, %c0_i32_0 : i32
    %c0_i32_1 = arith.constant 0 : i32
    %4 = arith.cmpi slt, %2, %c0_i32_1 : i32
    %c0_i32_2 = arith.constant 0 : i32
    %5 = arith.cmpi slt, %1, %c0_i32_2 : i32
    %6 = arith.xori %4, %5 : i1
    %7 = arith.andi %6, %3 : i1
    %8 = arith.addi %2, %1 : i32
    %9 = arith.select %7, %8, %2 : i32
    %c0_i32_3 = arith.constant 0 : i32
    %10 = arith.cmpi eq, %arg1, %c0_i32_3 : i32
    %11 = arith.extui %10 : i1 to i32
    %c0_i32_4 = arith.constant 0 : i32
    %12 = arith.cmpi ne, %11, %c0_i32_4 : i32
    scf.if %12 {
      %c0_i32_19 = arith.constant 0 : i32
      %46 = tpu.assume_multiple %c0_i32_19, 8 : i32
      %c0_i32_20 = arith.constant 0 : i32
      %c0_i32_21 = arith.constant 0 : i32
      %47 = tpu.memref_slice %arg2[%arg0, %c0_i32_20, %46, %c0_i32_21] : memref<2x1x18x128xf32, #tpu.memory_space<any>> -> memref<1x1x18x128xf32, #tpu.memory_space<any>>
      %48 = tpu.memref_squeeze %47 : memref<1x1x18x128xf32, #tpu.memory_space<any>> -> memref<18x128xf32, #tpu.memory_space<any>>
      %c0_i32_22 = arith.constant 0 : i32
      %c0_i32_23 = arith.constant 0 : i32
      %49 = tpu.memref_slice %arg4[%9, %c0_i32_22, %c0_i32_23] : memref<2x18x128xf32, #tpu.memory_space<vmem>> -> memref<1x18x128xf32, #tpu.memory_space<vmem>>
      %50 = tpu.memref_squeeze %49 : memref<1x18x128xf32, #tpu.memory_space<vmem>> -> memref<18x128xf32, #tpu.memory_space<vmem>>
      %51 = tpu.memref_slice %arg5[%9] : memref<2x!tpu.dma_semaphore, #tpu.memory_space<semaphore_mem>> -> memref<1x!tpu.dma_semaphore, #tpu.memory_space<semaphore_mem>>
      %52 = tpu.memref_squeeze %51 : memref<1x!tpu.dma_semaphore, #tpu.memory_space<semaphore_mem>> -> memref<!tpu.dma_semaphore, #tpu.memory_space<semaphore_mem>>
      tpu.enqueue_dma source(%48 : memref<18x128xf32, #tpu.memory_space<any>>) target(%50 : memref<18x128xf32, #tpu.memory_space<vmem>>) target_semaphore(%52 : memref<!tpu.dma_semaphore, #tpu.memory_space<semaphore_mem>>)
    } else {
    }
    %c1_i32_5 = arith.constant 1 : i32
    %13 = arith.addi %arg1, %c1_i32_5 : i32
    %c1_i32_6 = arith.constant 1 : i32
    %14 = arith.cmpi slt, %13, %c1_i32_6 : i32
    %15 = arith.extui %14 : i1 to i32
    %c0_i32_7 = arith.constant 0 : i32
    %16 = arith.cmpi ne, %15, %c0_i32_7 : i32
    scf.if %16 {
      %c1_i32_19 = arith.constant 1 : i32
      %46 = arith.addi %arg1, %c1_i32_19 : i32
      %c1_i32_20 = arith.constant 1 : i32
      %47 = arith.subi %c1_i32_20, %9 : i32
      %c16_i32_21 = arith.constant 16 : i32
      %48 = arith.muli %46, %c16_i32_21 : i32
      %49 = tpu.assume_multiple %48, 8 : i32
      %c0_i32_22 = arith.constant 0 : i32
      %c0_i32_23 = arith.constant 0 : i32
      %50 = tpu.memref_slice %arg2[%arg0, %c0_i32_22, %49, %c0_i32_23] : memref<2x1x18x128xf32, #tpu.memory_space<any>> -> memref<1x1x18x128xf32, #tpu.memory_space<any>>
      %51 = tpu.memref_squeeze %50 : memref<1x1x18x128xf32, #tpu.memory_space<any>> -> memref<18x128xf32, #tpu.memory_space<any>>
      %c0_i32_24 = arith.constant 0 : i32
      %c0_i32_25 = arith.constant 0 : i32
      %52 = tpu.memref_slice %arg4[%47, %c0_i32_24, %c0_i32_25] : memref<2x18x128xf32, #tpu.memory_space<vmem>> -> memref<1x18x128xf32, #tpu.memory_space<vmem>>
      %53 = tpu.memref_squeeze %52 : memref<1x18x128xf32, #tpu.memory_space<vmem>> -> memref<18x128xf32, #tpu.memory_space<vmem>>
      %54 = tpu.memref_slice %arg5[%47] : memref<2x!tpu.dma_semaphore, #tpu.memory_space<semaphore_mem>> -> memref<1x!tpu.dma_semaphore, #tpu.memory_space<semaphore_mem>>
      %55 = tpu.memref_squeeze %54 : memref<1x!tpu.dma_semaphore, #tpu.memory_space<semaphore_mem>> -> memref<!tpu.dma_semaphore, #tpu.memory_space<semaphore_mem>>
      tpu.enqueue_dma source(%51 : memref<18x128xf32, #tpu.memory_space<any>>) target(%53 : memref<18x128xf32, #tpu.memory_space<vmem>>) target_semaphore(%55 : memref<!tpu.dma_semaphore, #tpu.memory_space<semaphore_mem>>)
    } else {
    }
    %c16_i32 = arith.constant 16 : i32
    %17 = arith.muli %arg1, %c16_i32 : i32
    %18 = tpu.assume_multiple %17, 8 : i32
    %c0_i32_8 = arith.constant 0 : i32
    %c0_i32_9 = arith.constant 0 : i32
    %19 = tpu.memref_slice %arg2[%arg0, %c0_i32_8, %18, %c0_i32_9] : memref<2x1x18x128xf32, #tpu.memory_space<any>> -> memref<1x1x18x128xf32, #tpu.memory_space<any>>
    %20 = tpu.memref_squeeze %19 : memref<1x1x18x128xf32, #tpu.memory_space<any>> -> memref<18x128xf32, #tpu.memory_space<any>>
    %c0_i32_10 = arith.constant 0 : i32
    %c0_i32_11 = arith.constant 0 : i32
    %21 = tpu.memref_slice %arg4[%9, %c0_i32_10, %c0_i32_11] : memref<2x18x128xf32, #tpu.memory_space<vmem>> -> memref<1x18x128xf32, #tpu.memory_space<vmem>>
    %22 = tpu.memref_squeeze %21 : memref<1x18x128xf32, #tpu.memory_space<vmem>> -> memref<18x128xf32, #tpu.memory_space<vmem>>
    %23 = tpu.memref_slice %arg5[%9] : memref<2x!tpu.dma_semaphore, #tpu.memory_space<semaphore_mem>> -> memref<1x!tpu.dma_semaphore, #tpu.memory_space<semaphore_mem>>
    %24 = tpu.memref_squeeze %23 : memref<1x!tpu.dma_semaphore, #tpu.memory_space<semaphore_mem>> -> memref<!tpu.dma_semaphore, #tpu.memory_space<semaphore_mem>>
    tpu.wait_dma2 semaphore(%24 : memref<!tpu.dma_semaphore, #tpu.memory_space<semaphore_mem>>) src(%20 : memref<18x128xf32, #tpu.memory_space<any>>) dst(%22 : memref<18x128xf32, #tpu.memory_space<vmem>>)
    %25 = arith.index_cast %9 : i32 to index
    %c0 = arith.constant 0 : index
    %c0_12 = arith.constant 0 : index
    %26 = vector.load %arg4[%25, %c0, %c0_12] : memref<2x18x128xf32, #tpu.memory_space<vmem>>, vector<1x16x128xf32>
    %27 = vector.shape_cast %26 : vector<1x16x128xf32> to vector<16x128xf32>
    %28 = arith.index_cast %9 : i32 to index
    %c1 = arith.constant 1 : index
    %c0_13 = arith.constant 0 : index
    %29 = vector.load %arg4[%28, %c1, %c0_13] : memref<2x18x128xf32, #tpu.memory_space<vmem>>, vector<1x16x128xf32>
    %30 = vector.shape_cast %29 : vector<1x16x128xf32> to vector<16x128xf32>
    %31 = arith.index_cast %9 : i32 to index
    %c2 = arith.constant 2 : index
    %c0_14 = arith.constant 0 : index
    %32 = vector.load %arg4[%31, %c2, %c0_14] : memref<2x18x128xf32, #tpu.memory_space<vmem>>, vector<1x16x128xf32>
    %33 = vector.shape_cast %32 : vector<1x16x128xf32> to vector<16x128xf32>
    %34 = arith.addf %30, %30 : vector<16x128xf32>
    %35 = arith.addf %27, %34 : vector<16x128xf32>
    %36 = arith.addf %35, %33 : vector<16x128xf32>
    %37 = vector.extract_strided_slice %36 {offsets = [0, 2], sizes = [16, 126], strides = [1, 1]} : vector<16x128xf32> to vector<16x126xf32>
    %38 = vector.extract_strided_slice %36 {offsets = [0, 0], sizes = [16, 2], strides = [1, 1]} : vector<16x128xf32> to vector<16x2xf32>
    %39 = tpu.concatenate %37, %38 in 1 : vector<16x126xf32>, vector<16x2xf32> -> vector<16x128xf32>
    %40 = arith.subf %39, %36 : vector<16x128xf32>
    %41 = math.absf %40 : vector<16x128xf32>
    %42 = arith.addf %41, %41 : vector<16x128xf32>
    %c0_15 = arith.constant 0 : index
    %c0_16 = arith.constant 0 : index
    %c0_17 = arith.constant 0 : index
    %c0_18 = arith.constant 0 : index
    %43 = vector.load %arg3[%c0_15, %c0_16, %c0_17, %c0_18] : memref<1x1x16x128xf32, #tpu.memory_space<vmem>>, vector<1x1x16x128xf32>
    %44 = vector.shape_cast %43 : vector<1x1x16x128xf32> to vector<16x128xf32>
    %45 = vector.shape_cast %42 : vector<16x128xf32> to vector<1x1x16x128xf32>
    tpu.vector_store %arg3[%c0_15, %c0_16, %c0_17, %c0_18], %45 {strides = array<i32>} : memref<1x1x16x128xf32, #tpu.memory_space<vmem>>, vector<1x1x16x128xf32>,
    return
  }
  func.func @transform_1(%arg0: i32, %arg1: i32) -> (i32, i32, i32, i32) {
    %c0_i32 = arith.constant 0 : i32
    %c0_i32_0 = arith.constant 0 : i32
    %c0_i32_1 = arith.constant 0 : i32
    return %arg0, %c0_i32, %arg1, %c0_i32_0 : i32, i32, i32, i32
  }
}

</mosaic_0001>

<bundles_post_ra>
// kernel: gradient_net.1
= control target key start
LH: loop header
LB: loop body
LE: loop exit
PB: predicated region body
PF: predicated region fallthrough
CT: control target
= control target key end

     0   :  { %s432_s6 = smov 0   ;;  %s434_s7 = smov 0   ;;  %s459_s0 = inlined_call_operand.vmem [shape: f32[2,1,18,128], index: 0, kind: input, shape index: {}]   ;;  %s460_s1 = inlined_call_operand.vmem [shape: f32[2,1,14,14], index: 1, kind: output, shape index: {}]  }
   0x1 LB: > { %s20_s8 = sadd.s32 1, %s415_s6  ;;  %p372_p1 = scmp.ge.s32.totalorder %s419_s7, 2  ;;  %s419_s7 = sphi %s434_s7, %s11_s7   ;;  %s415_s6 = sphi %s432_s6, %s461_s6  }
   0x2   : > { %p22_p0 = scmp.ge.s32.totalorder %s20_s8, 2  ;;  %p61_p2 = scmp.lt.s32.totalorder (!%p372_p1), %s415_s6, 1 }
   0x3   : > { %48 = sbr.rel (%p372_p1) target bundleno = 149 (0x95), region = 12 }
   0x4   : > { %s463_s8 = smov (%p22_p0, %s20_s8), 0  ;;  %s86_s9 = smul.u32 (!%p372_p1), 24, %s415_s6 }
   0x6   : > { %s88_s12 = scalar_lea.vmem (!%p372_p1), %s459_s0, %s86_s9 }
   0x7   : > { %v129_v0 = vld [vmem:[%s88_s12] sm:$0xff] (!%p372_p1)  ;;  %v131_v1 = vld [vmem:[%s88_s12 + $0x8] sm:$0xff] (!%p372_p1)  ;;  %v375_v2 = vld [vmem:[%s88_s12 + $0x10] sm:$0x3] (!%p372_p1) }
   0x8   : > { %130 = vst [vmem:[#allocation2] sm:$0xff] (!%p372_p1), %v129_v0  ;;  %132 = vst [vmem:[#allocation2 + $0x8] sm:$0xff] (!%p372_p1), %v131_v1 }
   0x9   : > { %143 = vst [vmem:[#allocation2 + $0x10] sm:$0x3] (!%p372_p1), %v375_v2 }
   0xa   : > { %s465_s6 = smov (!%p61_p2, %s415_s6), 1 }
   0xb   : > { %s385_s13 = sshll.u32 %s465_s6, 4 }
   0xc   : > { %s449_s16 = scalar_lea.vmem %s460_s1, %s385_s13 }
   0xd   : > { %147 = vsyncadd [#allocation3], 288 }
   0xe   : > { %411 = dma.done.wait [#allocation3], 288 }
   0xf   : > { %412 = vsyncadd [#allocation3], 4294967008  ;;  %v224_v3 = vld [vmem:[#allocation2] sm:$0xff]  ;;  %v225_v6 = vld [vmem:[#allocation2 + $0x8] sm:$0xff]  ;;  %s421_s17 = smov 126  }
  0x10   : > { %v226_v4 = vld [vmem:[#allocation2 + $0x1] sm:$0xff]  ;;  %v227_v7 = vld [vmem:[#allocation2 + $0x9] sm:$0xff] }
  0x11   : > { %v230_v5 = vadd.f32 %v226_v4, %v226_v4  ;;  %v228_v8 = vld [vmem:[#allocation2 + $0x2] sm:$0xff]  ;;  %v231_v9 = vadd.f32 %v227_v7, %v227_v7  ;;  %v229_v11 = vld [vmem:[#allocation2 + $0xa] sm:$0xff] }
  0x13   : > { %v232_v10 = vadd.f32 %v230_v5, %v224_v3  ;;  %v233_v12 = vadd.f32 %v231_v9, %v225_v6 }
  0x15   : > { %v234_v13 = vadd.f32 %v232_v10, %v228_v8  ;;  %v235_v14 = vadd.f32 %v233_v12, %v229_v11 }
  0x17   : > { %238 = vrot.lane.b32.xlu0 %v234_v13, %s421_s17 }
  0x1b   : > { %240 = vrot.lane.b32.xlu0 %v235_v14, %s421_s17 }
  0x89   : > { %v239_v15 = vpop.permute.xlu0 %238 }
  0x8a   : > { %v244_v16 = vsub.f32 %v239_v15, %v234_v13 }
  0x8c   : > { %v246_v17 = vand.u32 2147483647, %v244_v16 }
  0x8d   : > { %v241_v18 = vpop.permute.xlu0 %240 }
  0x8e   : > { %v248_v19 = vadd.f32 %v246_v17, %v246_v17  ;;  %v245_v20 = vsub.f32 %v241_v18, %v235_v14 }
  0x90   : > { %250 = vst [vmem:[%s449_s16] sm:$0xff] %v248_v19  ;;  %v247_v21 = vand.u32 2147483647, %v245_v20 }
  0x92   : > { %v249_v22 = vadd.f32 %v247_v21, %v247_v21 }
  0x94   : > { %251 = vst [vmem:[%s449_s16 + $0x8] sm:$0xff] %v249_v22 }
  0x95 PF: > { %s11_s7 = sadd.s32 1, %s419_s7   ;;  %s461_s6 = smov %s463_s8 }
  0x96   : > { %p8_p3 = scmp.ge.s32.totalorder %s11_s7, 3  }
  0x98   :  { %10 = sbr.rel (!%p8_p3) target bundleno = 1 (0x1), region = 158 }
  0x9f   :  { %282 = vsyncmov [#allocation3] }
  0xa2   :  { %s283_s18 = vpop.sfrf %282 }
  0xa3   :  { %p383_p4 = scmp.ne.s32.totalorder %s283_s18, 0 }
  0xa5   :  { %287 = shalt.err (%p383_p4)  }
  0xa6   :  { %289 = vsyncmov [#allocation3 + $0x1] }
  0xa9   :  { %s290_s19 = vpop.sfrf %289 }
  0xaa   :  { %p384_p5 = scmp.ne.s32.totalorder %s290_s19, 0 }
  0xac   :  { %294 = shalt.err (%p384_p5)  }

</bundles_post_ra>
